<compile_context>
chip_gen: v6e
topology: v6e:2x2x1
jax: 0.10.0
libtpu: 0.0.40
codegen_flags: <defaults>
</compile_context>

<pallas_src>
import jax
import jax.numpy as jnp
from jax import lax
from jax.experimental import pallas as pl
from jax.experimental.pallas import tpu as pltpu


def _round_up(x, m):
    return (x + m - 1) // m * m


def _edge_loss_kernel(edge_ref, pred_ref, sum_ref, cnt_ref):
    # edge_ref: VMEM (E_TILE, 2) int32   -- one tile of (i0, i1) index pairs
    # pred_ref: VMEM (N, D)      float32 -- full resident point set
    # sum_ref : VMEM (1, 1)      float32 -- running masked sum of ||diff||^2
    # cnt_ref : VMEM (1, 1)      float32 -- running count of valid edges
    t = pl.program_id(0)

    @pl.when(t == 0)
    def _init():
        sum_ref[...] = jnp.zeros_like(sum_ref)
        cnt_ref[...] = jnp.zeros_like(cnt_ref)

    e_tile = edge_ref.shape[0]
    n = pred_ref.shape[0]

    i0 = edge_ref[:, 0:1]                                 # (E_TILE, 1) int32
    i1 = edge_ref[:, 1:2]                                 # (E_TILE, 1) int32
    mask = jnp.logical_or(i0 != 0, i1 != 0)               # (E_TILE, 1) bool

    # One-hot "gather": row e of sel selects pred[i0[e]] - pred[i1[e]].
    # TODO(synk): for very large point sets (N >> a few thousand) the one-hot
    # width scales with N; switch to a DMA/row-gather variant in that regime.
    col = lax.broadcasted_iota(jnp.int32, (e_tile, n), 1)
    sel = (col == i0).astype(jnp.float32) - (col == i1).astype(jnp.float32)
    diff = jnp.dot(
        sel, pred_ref[...],
        preferred_element_type=jnp.float32,
        precision=lax.Precision.HIGHEST,
    )                                                     # (E_TILE, D)

    sq = jnp.where(mask, diff * diff, 0.0)                # (E_TILE, D)
    per_edge = jnp.sum(sq, axis=1, keepdims=True)         # (E_TILE, 1)
    sum_ref[...] += jnp.sum(per_edge, axis=0, keepdims=True)
    cnt_ref[...] += jnp.sum(mask.astype(jnp.float32), axis=0, keepdims=True)


def edge_loss(pred, edge_list, *, edge_tile=512):
    """pred: (num_points, points_dim) float; edge_list: (2, num_edges) int."""
    pred = pred.astype(jnp.float32)
    num_points, points_dim = pred.shape
    num_edges = int(edge_list.shape[1])

    e_tile = min(edge_tile, _round_up(max(num_edges, 1), 8))
    e_pad = _round_up(max(num_edges, 1), e_tile)
    num_tiles = e_pad // e_tile

    edges = edge_list.astype(jnp.int32).T                 # (E, 2)
    if e_pad != num_edges:
        # Padded (0, 0) edges are masked out inside the kernel.
        edges = jnp.pad(edges, ((0, e_pad - num_edges), (0, 0)))

    # VMEM budget: resident pred + double-buffered edge tiles + headroom,
    # capped so the request stays legal on v7x's smaller (64 MiB) VMEM.
    vmem_needed = (2 * num_points * points_dim * 4
                   + 2 * e_tile * 2 * 4 + (2 << 20))
    vmem_limit = int(min(max(vmem_needed, 16 * 1024 * 1024),
                         48 * 1024 * 1024))

    out_sum, out_cnt = pl.pallas_call(
        _edge_loss_kernel,
        out_shape=(jax.ShapeDtypeStruct((1, 1), jnp.float32),
                   jax.ShapeDtypeStruct((1, 1), jnp.float32)),
        grid_spec=pltpu.PrefetchScalarGridSpec(
            num_scalar_prefetch=0,
            grid=(num_tiles,),
            in_specs=[
                pl.BlockSpec((e_tile, 2), lambda t: (t, 0)),
                pl.BlockSpec((num_points, points_dim), lambda t: (0, 0)),
            ],
            out_specs=[
                pl.BlockSpec((1, 1), lambda t: (0, 0)),
                pl.BlockSpec((1, 1), lambda t: (0, 0)),
            ],
        ),
        compiler_params=pltpu.CompilerParams(
            dimension_semantics=("arbitrary",),   # edge-tile axis accumulates
            vmem_limit_bytes=vmem_limit,
        ),
    )(edges, pred)

    # Mean over valid edges (0/0 -> NaN, matching torch.mean of an empty tensor).
    return out_sum[0, 0] / out_cnt[0, 0]


if __name__ == "__main__":
    key = jax.random.PRNGKey(0)
    k1, k2 = jax.random.split(key)

    num_points, points_dim, num_edges = 32, 8, 16
    pred = jax.random.normal(k1, (num_points, points_dim), dtype=jnp.float32)
    edge_list = jax.random.randint(
        k2, (2, num_edges), 0, num_points, dtype=jnp.int32
    )
    # Force a few padded (0, 0) edges so the edge_mask path is exercised.
    edge_list = edge_list.at[:, :3].set(0)

    loss = jax.block_until_ready(edge_loss(pred, edge_list))

    # Pure-JAX reference (mirrors the PyTorch forward semantics).
    mask = (edge_list[0] != 0) | (edge_list[1] != 0)
    edges = pred[edge_list[0]] - pred[edge_list[1]]
    per_edge = jnp.sum(edges ** 2, axis=1)
    ref = jnp.sum(jnp.where(mask, per_edge, 0.0)) / jnp.sum(mask)

    assert jnp.allclose(loss, ref, rtol=1e-4, atol=1e-4), (loss, ref)
    print("KERNEL_OK")
</pallas_src>

<mosaic_0001>
module attributes {stable_mosaic.version = 11 : i64} {
  func.func @_edge_loss_kernel(%arg0: i32, %arg1: memref<16x2xi32, #tpu.memory_space<vmem>>, %arg2: memref<32x8xf32, #tpu.memory_space<vmem>>, %arg3: memref<1x1xf32, #tpu.memory_space<vmem>>, %arg4: memref<1x1xf32, #tpu.memory_space<vmem>>) attributes {dimension_semantics = [#tpu.dimension_semantics<arbitrary>], iteration_bounds = array<i64: 1>, scalar_prefetch = 0 : i64, scratch_operands = 0 : i64, tpu.core_type = #tpu.core_type<tc>, window_params = [{transform_indices = @transform_0, window_bounds = array<i64: 16, 2>}, {pipeline_mode = #tpu.pipeline_mode<synchronous>, transform_indices = @transform_1, window_bounds = array<i64: 32, 8>}, {pipeline_mode = #tpu.pipeline_mode<synchronous>, transform_indices = @transform_2, window_bounds = array<i64: 1, 1>}, {pipeline_mode = #tpu.pipeline_mode<synchronous>, transform_indices = @transform_3, window_bounds = array<i64: 1, 1>}]} {
    %c0_i32 = arith.constant 0 : i32
    %0 = arith.cmpi eq, %arg0, %c0_i32 : i32
    %1 = arith.extui %0 : i1 to i32
    %c0_i32_0 = arith.constant 0 : i32
    %2 = arith.cmpi ne, %1, %c0_i32_0 : i32
    scf.if %2 {
      %cst_19 = arith.constant 0.000000e+00 : f32
      %41 = vector.broadcast %cst_19 : f32 to vector<1x1xf32>
      %c0_20 = arith.constant 0 : index
      %c0_21 = arith.constant 0 : index
      %42 = vector.load %arg3[%c0_20, %c0_21] : memref<1x1xf32, #tpu.memory_space<vmem>>, vector<1x1xf32>
      tpu.vector_store %arg3[%c0_20, %c0_21], %41 {strides = array<i32>} : memref<1x1xf32, #tpu.memory_space<vmem>>, vector<1x1xf32>,
      %cst_22 = arith.constant 0.000000e+00 : f32
      %43 = vector.broadcast %cst_22 : f32 to vector<1x1xf32>
      %c0_23 = arith.constant 0 : index
      %c0_24 = arith.constant 0 : index
      %44 = vector.load %arg4[%c0_23, %c0_24] : memref<1x1xf32, #tpu.memory_space<vmem>>, vector<1x1xf32>
      tpu.vector_store %arg4[%c0_23, %c0_24], %43 {strides = array<i32>} : memref<1x1xf32, #tpu.memory_space<vmem>>, vector<1x1xf32>,
    } else {
    }
    %c0 = arith.constant 0 : index
    %c0_1 = arith.constant 0 : index
    %3 = vector.load %arg1[%c0, %c0_1] : memref<16x2xi32, #tpu.memory_space<vmem>>, vector<16x1xi32>
    %c0_2 = arith.constant 0 : index
    %c1 = arith.constant 1 : index
    %4 = vector.load %arg1[%c0_2, %c1] : memref<16x2xi32, #tpu.memory_space<vmem>>, vector<16x1xi32>
    %c0_i32_3 = arith.constant 0 : i32
    %5 = vector.broadcast %c0_i32_3 : i32 to vector<16x1xi32>
    %6 = arith.cmpi ne, %3, %5 : vector<16x1xi32>
    %c0_i32_4 = arith.constant 0 : i32
    %7 = vector.broadcast %c0_i32_4 : i32 to vector<16x1xi32>
    %8 = arith.cmpi ne, %4, %7 : vector<16x1xi32>
    %9 = arith.ori %6, %8 : vector<16x1xi1>
    %10 = tpu.iota {dimensions = array<i32: 1>} : vector<16x32xi32>
    %11 = vector.broadcast %3 : vector<16x1xi32> to vector<16x32xi32>
    %12 = arith.cmpi eq, %10, %11 : vector<16x32xi32>
    %13 = arith.extui %12 : vector<16x32xi1> to vector<16x32xi32>
    %14 = arith.sitofp %13 : vector<16x32xi32> to vector<16x32xf32>
    %15 = vector.broadcast %4 : vector<16x1xi32> to vector<16x32xi32>
    %16 = arith.cmpi eq, %10, %15 : vector<16x32xi32>
    %17 = arith.extui %16 : vector<16x32xi1> to vector<16x32xi32>
    %18 = arith.sitofp %17 : vector<16x32xi32> to vector<16x32xf32>
    %19 = arith.subf %14, %18 : vector<16x32xf32>
    %c0_5 = arith.constant 0 : index
    %c0_6 = arith.constant 0 : index
    %20 = vector.load %arg2[%c0_5, %c0_6] : memref<32x8xf32, #tpu.memory_space<vmem>>, vector<32x8xf32>
    %cst = arith.constant dense<0.000000e+00> : vector<16x8xf32>
    %21 = tpu.matmul %19, %20, %cst {dimension_numbers = #tpu.dot_dimension_numbers<[1], [0], [0], [1], [0, 0, 1, 1], [], []>, precision = #tpu.contract_precision<fp32>} : vector<16x32xf32>, vector<32x8xf32>, vector<16x8xf32> -> vector<16x8xf32>
    %22 = arith.mulf %21, %21 : vector<16x8xf32>
    %cst_7 = arith.constant 0.000000e+00 : f32
    %23 = vector.shape_cast %9 : vector<16x1xi1> to vector<16x1xi1>
    %24 = vector.broadcast %23 : vector<16x1xi1> to vector<16x8xi1>
    %25 = vector.broadcast %cst_7 : f32 to vector<16x8xf32>
    %26 = arith.select %24, %22, %25 : vector<16x8xi1>, vector<16x8xf32>
    %cst_8 = arith.constant dense<0.000000e+00> : vector<16xf32>
    %27 = vector.multi_reduction <add>, %26, %cst_8 [1] : vector<16x8xf32> to vector<16xf32>
    %28 = vector.shape_cast %27 : vector<16xf32> to vector<16x1xf32>
    %c0_9 = arith.constant 0 : index
    %c0_10 = arith.constant 0 : index
    %29 = vector.load %arg3[%c0_9, %c0_10] : memref<1x1xf32, #tpu.memory_space<vmem>>, vector<1x1xf32>
    %cst_11 = arith.constant dense<0.000000e+00> : vector<1xf32>
    %30 = vector.multi_reduction <add>, %28, %cst_11 [0] : vector<16x1xf32> to vector<1xf32>
    %31 = vector.shape_cast %30 : vector<1xf32> to vector<1x1xf32>
    %32 = arith.addf %29, %31 : vector<1x1xf32>
    %c0_12 = arith.constant 0 : index
    %c0_13 = arith.constant 0 : index
    %33 = vector.load %arg3[%c0_12, %c0_13] : memref<1x1xf32, #tpu.memory_space<vmem>>, vector<1x1xf32>
    tpu.vector_store %arg3[%c0_12, %c0_13], %32 {strides = array<i32>} : memref<1x1xf32, #tpu.memory_space<vmem>>, vector<1x1xf32>,
    %c0_14 = arith.constant 0 : index
    %c0_15 = arith.constant 0 : index
    %34 = vector.load %arg4[%c0_14, %c0_15] : memref<1x1xf32, #tpu.memory_space<vmem>>, vector<1x1xf32>
    %35 = arith.extui %9 : vector<16x1xi1> to vector<16x1xi32>
    %36 = arith.sitofp %35 : vector<16x1xi32> to vector<16x1xf32>
    %cst_16 = arith.constant dense<0.000000e+00> : vector<1xf32>
    %37 = vector.multi_reduction <add>, %36, %cst_16 [0] : vector<16x1xf32> to vector<1xf32>
    %38 = vector.shape_cast %37 : vector<1xf32> to vector<1x1xf32>
    %39 = arith.addf %34, %38 : vector<1x1xf32>
    %c0_17 = arith.constant 0 : index
    %c0_18 = arith.constant 0 : index
    %40 = vector.load %arg4[%c0_17, %c0_18] : memref<1x1xf32, #tpu.memory_space<vmem>>, vector<1x1xf32>
    tpu.vector_store %arg4[%c0_17, %c0_18], %39 {strides = array<i32>} : memref<1x1xf32, #tpu.memory_space<vmem>>, vector<1x1xf32>,
    return
  }
  func.func @transform_0(%arg0: i32) -> (i32, i32) {
    %c0_i32 = arith.constant 0 : i32
    %c0_i32_0 = arith.constant 0 : i32
    return %arg0, %c0_i32 : i32, i32
  }
  func.func @transform_1(%arg0: i32) -> (i32, i32) {
    %c0_i32 = arith.constant 0 : i32
    %c0_i32_0 = arith.constant 0 : i32
    %c0_i32_1 = arith.constant 0 : i32
    return %c0_i32, %c0_i32_0 : i32, i32
  }
  func.func @transform_2(%arg0: i32) -> (i32, i32) {
    %c0_i32 = arith.constant 0 : i32
    %c0_i32_0 = arith.constant 0 : i32
    %c0_i32_1 = arith.constant 0 : i32
    return %c0_i32, %c0_i32_0 : i32, i32
  }
  func.func @transform_3(%arg0: i32) -> (i32, i32) {
    %c0_i32 = arith.constant 0 : i32
    %c0_i32_0 = arith.constant 0 : i32
    %c0_i32_1 = arith.constant 0 : i32
    return %c0_i32, %c0_i32_0 : i32, i32
  }
}

</mosaic_0001>

<bundles_post_ra>
// kernel: tpu_custom_call.1
= control target key start
LH: loop header
LB: loop body
LE: loop exit
PB: predicated region body
PF: predicated region fallthrough
CT: control target
= control target key end

     0   :  { %9 = vsyncpa [#allocation3], 0  ;;  %v842_v2 = vmov 0   ;;  %s1010_s0 = inlined_call_operand.vmem [shape: s32[16,2], index: 0, kind: input, shape index: {}]   ;;  %s1011_s1 = inlined_call_operand.vmem [shape: f32[32,8], index: 1, kind: input, shape index: {}]   ;;  %s1012_s2 = inlined_call_operand.hbm [shape: f32[1,1], index: 2, kind: output, shape index: {0}]   ;;  %s1013_s3 = inlined_call_operand.hbm [shape: f32[1,1], index: 3, kind: output, shape index: {1}]  }
   0x1   :  { %v871_v0 = vld [vmem:[%s1010_s0 + $0x8] sm:$0xff]  ;;  %v876_v1 = vld [vmem:[%s1010_s0] sm:$0xff]  ;;  %794 = vset.pattern.permute.xlu1 %v842_v2  ;;  %792 = vset.pattern.permute.xlu0 %v842_v2  ;;  %v67_v3 = vld [vmem:[%s1011_s1 + $0x18] sm:$0xff] }
   0x2   :  { %v66_v4 = vld [vmem:[%s1011_s1 + $0x10] sm:$0xff]  ;;  %v65_v5 = vld [vmem:[%s1011_s1 + $0x8] sm:$0xff]  ;;  %42 = vperm.xlu1 %794, %v871_v0   ;;  %39 = vperm.xlu0 %792, %v876_v1   ;;  %v891_v6 = vand.u32 4294901760, %v67_v3  ;;  %v64_v7 = vld [vmem:[%s1011_s1] sm:$0xff] }
   0x3   :  { %v896_v8 = vand.u32 4294901760, %v66_v4  ;;  %v898_v9 = vand.u32 4294901760, %v65_v5  ;;  %v900_v10 = vand.u32 4294901760, %v64_v7 }
   0x4   :  { %10 = vsyncpa [#allocation5], 0  ;;  %vm25_vm0 = vcmp.ne.s32.totalorder %v871_v0, 0  ;;  %v904_v11 = vsub.f32 %v67_v3, %v891_v6  ;;  %720 = vmatprep.subr.mxu0 %v891_v6  ;;  %vm24_vm1 = vcmp.ne.s32.totalorder %v876_v1, 0  ;;  %v843_v15 = vmov 1   ;;  %s844_s1 = smov 127  }
   0x5   :  { %v909_v12 = vsub.f32 %v66_v4, %v896_v8  ;;  %v912_v13 = vsub.f32 %v65_v5, %v898_v9  ;;  %v915_v14 = vsub.f32 %v64_v7, %v900_v10  ;;  %721 = vmatpush3.msra.mxu0 %v891_v6  ;;  %v27_v20 = vsel %vm25_vm0, 1, %v842_v2  ;;  %s846_s23 = smov [#allocation4]  }
   0x6   :  { %795 = vset.pattern.permute.xlu1 %v843_v15  ;;  %793 = vset.pattern.permute.xlu0 %v843_v15  ;;  %v919_v16 = vand.u32 4294901760, %v904_v11  ;;  %v26_v21 = vsel %vm24_vm1, 1, %v842_v2  ;;  %vm19_vm2 = vcmask 0   ;;  %v845_v30 = vmov 0.0   ;;  %s666_s24 = sshll.u32 %s846_s23, 4  ;;  %s667_s24 = int_to_ptr.vmem [resolvable:$true] %s666_s24 }
   0x7   :  { %54 = vperm.xlu1 %795, %v871_v0   ;;  %51 = vperm.xlu0 %793, %v876_v1   ;;  %v924_v17 = vand.u32 4294901760, %v909_v12  ;;  %v927_v18 = vand.u32 4294901760, %v912_v13  ;;  %v930_v19 = vand.u32 4294901760, %v915_v14  ;;  %20 = vst.msk [vmem:[#allocation2] sm:$0x1] %vm19_vm2, %v845_v30  ;;  %v36_v31 = vlaneseq  ;;  %s798_s25 = scalar_lea.vmem %s667_s24, 16  ;;  %p803_p1 = scmp.lt.s32.totalorder %s667_s24, %s667_s24 }
   0x8   :  { %v192_v22 = vsub.f32 %v904_v11, %v919_v16  ;;  %722 = vmatprep.subr.mxu0 %v896_v8  ;;  %21 = vst.msk [vmem:[#allocation4] sm:$0x1] %vm19_vm2, %v845_v30  ;;  %vm68_vm5 = vcmask 261120   ;;  %vm638_vm8 = vcmask 7168   ;;  %vm617_vm14 = vcmask 64512   ;;  %p799_p0 = scmp.ne.s32.totalorder %s667_s24, %s798_s25  ;;  %s802_s26 = scalar_lea.vmem %s667_s24, 32 }
   0x9   :  { %v199_v23 = vsub.f32 %v909_v12, %v924_v17  ;;  %v206_v24 = vsub.f32 %v912_v13, %v927_v18  ;;  %723 = vmatpush3.msra.mxu0 %v896_v8  ;;  %v213_v26 = vsub.f32 %v915_v14, %v930_v19  ;;  %v37_v32 = vand.u32 127, %v36_v31  ;;  %p804_p2 = scmp.lt.s32.totalorder %s802_s26, %s798_s25 }
   0xa   :  { %v193_v25 = vand.u32 4294901760, %v192_v22  ;;  %724 = vmatprep.subr.mxu0 %v898_v9 }
   0xb   :  { %30 = vrot.lane.b32.xlu0 %v27_v20, %s844_s1  ;;  %28 = vrot.lane.b32.xlu1 %v26_v21, %s844_s1  ;;  %v200_v27 = vand.u32 4294901760, %v199_v23  ;;  %v207_v28 = vand.u32 4294901760, %v206_v24  ;;  %v214_v29 = vand.u32 4294901760, %v213_v26  ;;  %p805_p3 = por %p804_p2, %p803_p1 }
   0xc   :  { %731 = vmatprep.subr.mxu1 %v193_v25  ;;  %725 = vmatpush3.msra.mxu0 %v898_v9 }
   0xd   :  { %732 = vmatpush3.msra.mxu1 %v193_v25  ;;  %726 = vmatprep.subr.mxu0 %v900_v10  ;;  %p806_p4 = pnand %p805_p3, %p799_p0 }
   0xe   :  { %733 = vmatprep.subr.mxu1 %v200_v27  ;;  %727 = vmatpush3.msra.mxu0 %v900_v10 }
   0xf   :  { %734 = vmatpush3.msra.mxu1 %v200_v27  ;;  %742 = vmatprep.subr.mxu0 %v904_v11  ;;  %v635_v5 = vld [vmem:[#allocation4] sm:$0x1] }
  0x10   :  { %735 = vmatprep.subr.mxu1 %v207_v28  ;;  %797 = vset.pattern.permute.xlu0 %v842_v2 }
  0x11   :  { %736 = vmatpush3.msra.mxu1 %v207_v28  ;;  %796 = vset.pattern.permute.xlu1 %v842_v2 }
  0x12   :  { %737 = vmatprep.subr.mxu1 %v214_v29 }
  0x13   :  { %738 = vmatpush3.msra.mxu1 %v214_v29 }
  0x14   :  { %753 = vmatprep.subr.mxu1 %v891_v6 }
  0x7d   :  { %v40_v33 = vpop.permute.xlu0 %39  ;;  %v43_v34 = vpop.permute.xlu1 %42 }
  0x7e   :  { %vm44_vm3 = vcmp.eq.s32.totalorder %v37_v32, %v40_v33  ;;  %vm45_vm4 = vcmp.eq.s32.totalorder %v37_v32, %v43_v34 }
  0x7f   :  { %v678_v37 = vsel %vm44_vm3, 1.0, %v845_v30  ;;  %v679_v38 = vsel %vm45_vm4, 1.0, %v845_v30 }
  0x82   :  { %v55_v35 = vpop.permute.xlu1 %54  ;;  %v52_v36 = vpop.permute.xlu0 %51 }
  0x83   :  { %vm57_vm6 = vcmp.eq.s32.totalorder %v37_v32, %v55_v35  ;;  %vm56_vm7 = vcmp.eq.s32.totalorder %v37_v32, %v52_v36 }
  0x84   :  { %v681_v39 = vsel %vm57_vm6, 1.0, %v845_v30  ;;  %v680_v40 = vsel %vm56_vm7, 1.0, %v845_v30 }
  0x85   :  { %v63_v41 = vsub.f32 %v679_v38, %v681_v39  ;;  %v62_v42 = vsub.f32 %v678_v37, %v680_v40 }
  0x86   :  { %v31_v43 = vpop.permute.xlu0 %30  ;;  %v29_v44 = vpop.permute.xlu1 %28 }
  0x87   :  { %v73_v45 = vsel %vm68_vm5, %v63_v41, 0  ;;  %v70_v46 = vsel %vm68_vm5, %v62_v42, 0  ;;  %vm33_vm9 = vcmp.ne.s32.totalorder %v31_v43, 0  ;;  %vm32_vm10 = vcmp.ne.s32.totalorder %v29_v44, 0 }
  0x88   :  { %v958_v47 = vand.u32 4294901760, %v73_v45  ;;  %v144_v48 = vand.u32 4294901760, %v70_v46  ;;  %vm35_vm11 = vmor %vm25_vm0, %vm33_vm9 }
  0x89   :  { %v683_v49 = vsel %vm35_vm11, 1.0, %v845_v30  ;;  %vm34_vm12 = vmor %vm24_vm1, %vm32_vm10  ;;  %v606_v50 = vsel %vm35_vm11, 1, %v842_v2 }
  0x8a   :  { %v155_v51 = vsub.f32 %v73_v45, %v958_v47  ;;  %v145_v52 = vsub.f32 %v70_v46, %v144_v48  ;;  %739 = vmatprep.mubr.f32.mxu1 %v144_v48  ;;  %v640_v53 = vsel %vm638_vm8, %v683_v49, 0.0  ;;  %v682_v54 = vsel %vm34_vm12, 1.0, %v845_v30  ;;  %611 = vperm.xlu0 %797, %v606_v50  }
  0x8b   :  { %740 = vmatmul.mubr.f32.vlgmr.msra.gmra.mxu1 %v958_v47  ;;  %v639_v55 = vsel %vm638_vm8, %v682_v54, 0.0  ;;  %v605_v56 = vsel %vm34_vm12, 1, %v842_v2 }
  0x8c   :  { %754 = vmatpush3.msra.mxu1 %v891_v6  ;;  %v146_v57 = vand.u32 4294901760, %v145_v52  ;;  %v156_v58 = vand.u32 4294901760, %v155_v51  ;;  %v641_v59 = vadd.f32 %v640_v53, %v639_v55  ;;  %608 = vperm.xlu1 %796, %v605_v56  }
  0x8d   :  { %755 = vmatprep.subr.mxu1 %v896_v8 }
  0x8e   :  { %756 = vmatpush3.msra.mxu1 %v896_v8  ;;  %761 = vmatprep.mubr.f32.mxu1 %v146_v57  ;;  %v147_v60 = vsub.f32 %v145_v52, %v146_v57  ;;  %v157_v61 = vsub.f32 %v155_v51, %v156_v58  ;;  %v642_v62 = vrot.slane %v641_v59, 4 }
  0x8f   :  { %757 = vmatprep.subr.mxu1 %v898_v9 }
  0x90   :  { %758 = vmatpush3.msra.mxu1 %v898_v9  ;;  %v148_v63 = vand.u32 4294901760, %v147_v60  ;;  %v158_v0 = vand.u32 4294901760, %v157_v61  ;;  %v643_v1 = vadd.f32 %v642_v62, %v641_v59 }
  0x91   :  { %759 = vmatprep.subr.mxu1 %v900_v10 }
  0x92   :  { %760 = vmatpush3.msra.mxu1 %v900_v10  ;;  %728 = vmatprep.mubr.f32.mxu0 %v148_v63  ;;  %v644_v2 = vrot.slane %v643_v1, 2 }
  0x93   :  { %762 = vmatmul.mubr.f32.vlgmr.msra.gmra.mxu1 %v156_v58  ;;  %775 = vmatprep.subr.mxu1 %v891_v6 }
  0x94   :  { %729 = vmatmul.mubr.f32.vlgmr.msra.gmra.mxu0 %v158_v0  ;;  %776 = vmatpush3.msra.mxu1 %v891_v6  ;;  %v645_v3 = vadd.f32 %v644_v2, %v643_v1 }
  0x95   :  { %743 = vmatpush3.msra.mxu0 %v904_v11  ;;  %783 = vmatprep.mubr.f32.mxu1 %v144_v48 }
  0x96   :  { %744 = vmatprep.subr.mxu0 %v909_v12  ;;  %750 = vmatprep.mubr.f32.mxu0 %v145_v52  ;;  %v646_v4 = vrot.slane %v645_v3, 1 }
  0x97   :  { %777 = vmatprep.subr.mxu1 %v896_v8  ;;  %745 = vmatpush3.msra.mxu0 %v909_v12 }
  0x98   :  { %778 = vmatpush3.msra.mxu1 %v896_v8  ;;  %746 = vmatprep.subr.mxu0 %v912_v13  ;;  %v647_v7 = vadd.f32 %v646_v4, %v645_v3 }
  0x99   :  { %779 = vmatprep.subr.mxu1 %v898_v9  ;;  %747 = vmatpush3.msra.mxu0 %v912_v13 }
  0x9a   :  { %780 = vmatpush3.msra.mxu1 %v898_v9  ;;  %748 = vmatprep.subr.mxu0 %v915_v14  ;;  %v648_v6 = vadd.f32 %v647_v7, %v635_v5 }
  0x9b   :  { %781 = vmatprep.subr.mxu1 %v900_v10  ;;  %749 = vmatpush3.msra.mxu0 %v915_v14 }
  0x9c   :  { %782 = vmatpush3.msra.mxu1 %v900_v10  ;;  %751 = vmatmul.mubr.f32.vlgmr.msra.gmra.mxu0 %v155_v51  ;;  %649 = vst.msk [vmem:[#allocation4] sm:$0x1] %vm19_vm2, %v648_v6 }
  0x9d   :  { %764 = vmatprep.subr.mxu0 %v919_v16  ;;  %784 = vmatmul.mubr.f32.vlgmr.msra.gmra.mxu1 %v958_v47 }
  0x9e   :  { %765 = vmatpush3.msra.mxu0 %v919_v16  ;;  %772 = vmatprep.mubr.f32.mxu0 %v144_v48 }
  0x9f   :  { %766 = vmatprep.subr.mxu0 %v924_v17 }
  0xa0   :  { %767 = vmatpush3.msra.mxu0 %v924_v17 }
  0xa1   :  { %768 = vmatprep.subr.mxu0 %v927_v18 }
  0xa2   :  { %769 = vmatpush3.msra.mxu0 %v927_v18 }
  0xa3   :  { %770 = vmatprep.subr.mxu0 %v930_v19 }
  0xa4   :  { %771 = vmatpush3.msra.mxu0 %v930_v19 }
  0xa5   :  { %773 = vmatmul.mubr.f32.vlgmr.msra.gmra.mxu0 %v958_v47 }
 0x105   :  { %v612_v19 = vpop.permute.xlu0 %611 }
 0x106   :  { %vm614_vm13 = vcmp.eq.s32.totalorder %v612_v19, 1 }
 0x107   :  { %v609_v29 = vpop.permute.xlu1 %608 }
 0x108   :  { %vm613_vm15 = vcmp.eq.s32.totalorder %v609_v29, 1 }
 0x14b   :  { %v741_v9 = vpop.f32.mrf.mxu1 }
 0x14d   :  { %v251_v12 = vpop.f32.mrf.mxu1 }
 0x153   :  { %v763_v14 = vpop.f32.mrf.mxu1 }
 0x154   :  { %v730_v8 = vpop.f32.mrf.mxu0 }
 0x155   :  { %v258_v13 = vadd.f32 %v741_v9, %v730_v8  ;;  %v421_v21 = vpop.f32.mrf.mxu1 }
 0x156   :  { %v150_v10 = vpop.f32.mrf.mxu0 }
 0x157   :  { %v252_v16 = vadd.f32 %v251_v12, %v150_v10 }
 0x15c   :  { %v752_v11 = vpop.f32.mrf.mxu0 }
 0x15d   :  { %v345_v17 = vadd.f32 %v752_v11, %v258_v13  ;;  %v785_v18 = vpop.f32.mrf.mxu1 }
 0x15e   :  { %v337_v15 = vpop.f32.mrf.mxu0 }
 0x15f   :  { %v338_v20 = vadd.f32 %v337_v15, %v252_v16  ;;  %v430_v22 = vadd.f32 %v763_v14, %v345_v17  ;;  %v593_v30 = vpop.f32.mrf.mxu1 }
 0x161   :  { %v422_v25 = vadd.f32 %v421_v21, %v338_v20 }
 0x165   :  { %v774_v23 = vpop.f32.mrf.mxu0 }
 0x166   :  { %v519_v24 = vadd.f32 %v774_v23, %v430_v22 }
 0x167   :  { %v512_v26 = vpop.f32.mrf.mxu0 }
 0x168   :  { %v600_v27 = vadd.f32 %v785_v18, %v519_v24  ;;  %v513_v28 = vadd.f32 %v512_v26, %v422_v25 }
 0x16a   :  { %v604_v31 = vmul.f32 %v600_v27, %v600_v27  ;;  %v594_v32 = vadd.f32 %v593_v30, %v513_v28 }
 0x16c   :  { %v603_v33 = vmul.f32 %v594_v32, %v594_v32  ;;  %v616_v34 = vsel %vm614_vm13, %v604_v31, 0.0 }
 0x16d   :  { %v621_v35 = vsel %vm617_vm14, %v616_v34, 0.0 }
 0x16e   :  { %622 = vadd.xlane.f32.xlu0 %v621_v35  ;;  %v615_v36 = vsel %vm613_vm15, %v603_v33, 0.0 }
 0x16f   :  { %v618_v37 = vsel %vm617_vm14, %v615_v36, 0.0 }
 0x170   :  { %619 = vadd.xlane.f32.xlu1 %v618_v37 }
 0x171   :  { %809 = shalt.err (!%p806_p4)
}
 0x172   :  { %669 = dma.vmem_to_hbm [thread:$0]  %s667_s24, 16, %s1013_s3, [#allocation5]   ;;  %v624_v46 = vld [vmem:[#allocation2] sm:$0x1] }
 0x173   :  { %s847_s29 = smov [#allocation2]  }
 0x174   :  { %s656_s30 = sshll.u32 %s847_s29, 4  ;;  %s657_s30 = int_to_ptr.vmem [resolvable:$true] %s656_s30 }
 0x175   :  { %s818_s4 = scalar_lea.vmem %s657_s30, 16  ;;  %s822_s5 = scalar_lea.vmem %s657_s30, 32 }
 0x176   :  { %p819_p5 = scmp.ne.s32.totalorder %s657_s30, %s818_s4  ;;  %p823_p6 = scmp.lt.s32.totalorder %s657_s30, %s657_s30 }
 0x177   :  { %p824_p7 = scmp.lt.s32.totalorder %s822_s5, %s818_s4 }
 0x179   :  { %p825_p8 = por %p824_p7, %p823_p6 }
 0x17b   :  { %p826_p9 = pnand %p825_p8, %p819_p5 }
 0x1f7   :  { %v623_v38 = vpop.xlane.xlu0 %622 }
 0x1f9   :  { %v620_v39 = vpop.xlane.xlu1 %619 }
 0x1fa   :  { %v625_v40 = vadd.f32 %v623_v38, %v620_v39 }
 0x1fc   :  { %v626_v41 = vrot.slane %v625_v40, 4 }
 0x1fe   :  { %v627_v42 = vadd.f32 %v626_v41, %v625_v40 }
 0x200   :  { %v628_v43 = vrot.slane %v627_v42, 2 }
 0x202   :  { %v629_v44 = vadd.f32 %v628_v43, %v627_v42 }
 0x204   :  { %v630_v45 = vrot.slane %v629_v44, 1 }
 0x206   :  { %v631_v47 = vadd.f32 %v630_v45, %v629_v44 }
 0x208   :  { %v632_v48 = vadd.f32 %v631_v47, %v624_v46 }
 0x20a   :  { %634 = vst.msk [vmem:[#allocation2] sm:$0x1] %vm19_vm2, %v632_v48 }
 0x20b   :  { %829 = shalt.err (!%p826_p9)
}
 0x20c   :  { %659 = dma.vmem_to_hbm [thread:$0]  %s657_s30, 16, %s1012_s2, [#allocation3]  }
 0x20d   :  { %838 = dma.done.wait [#allocation3], 16  }
 0x20e   :  { %839 = vsyncadd [#allocation3], 4294967280 }
 0x20f   :  { %840 = dma.done.wait [#allocation5], 16  }
 0x210   :  { %841 = vsyncadd [#allocation5], 4294967280 }
 0x211   :  { %676 = vsyncpa [#allocation3], 1 }
 0x212   :  { %677 = vsyncpa [#allocation5], 1 }

</bundles_post_ra>
